<compile_context>
chip_gen: v6e
topology: v6e:2x2x1
jax: 0.10.0
libtpu: 0.0.40
codegen_flags: <defaults>
</compile_context>

<pallas_src>
import functools

import jax
import jax.numpy as jnp
from jax.experimental import pallas as pl
from jax.experimental.pallas import tpu as pltpu

LANE = 128      # lane width (last dim tiling)
SUBLANE = 8     # sublane width (second-to-last dim tiling)


def _round_up(n, m):
    return -(-n // m) * m


def _mlp_kernel(x_ref, w1_ref, b1_ref, w2_ref, b2_ref, w3_ref, b3_ref, o_ref,
                *, lparam):
    # x_ref: [TB, in_p] bf16; weights: bf16 [in, out]; biases: f32 [1, out].
    # Matmuls hit the MXU in bf16 with f32 accumulation; bias + LeakyReLU on the VPU.
    h = jnp.dot(x_ref[...], w1_ref[...],
                preferred_element_type=jnp.float32) + b1_ref[...]
    h = jnp.where(h >= 0, h, lparam * h)                # LeakyReLU(lparam)

    h = jnp.dot(h.astype(jnp.bfloat16), w2_ref[...],
                preferred_element_type=jnp.float32) + b2_ref[...]
    h = jnp.where(h >= 0, h, lparam * h)                # LeakyReLU(lparam)

    y = jnp.dot(h.astype(jnp.bfloat16), w3_ref[...],
                preferred_element_type=jnp.float32) + b3_ref[...]
    o_ref[...] = y.astype(o_ref.dtype)


def prepare_params(params):
    """One-time: pad feature dims to lane multiples, cast weights to bf16.

    Keeps the per-call forward free of weight padding / casting ops.
    Returns (padded_params, (input_size, width, output_size)).
    """
    w1, b1, w2, b2, w3, b3 = (params[k] for k in ("w1", "b1", "w2", "b2", "w3", "b3"))
    in_size, width = w1.shape
    out_size = w3.shape[1]
    in_p = _round_up(in_size, LANE)
    wid_p = _round_up(width, LANE)
    out_p = _round_up(out_size, LANE)

    def pad2(a, rows, cols):
        return jnp.pad(a, ((0, rows - a.shape[0]), (0, cols - a.shape[1])))

    padded = dict(
        w1=pad2(w1, in_p, wid_p).astype(jnp.bfloat16),
        w2=pad2(w2, wid_p, wid_p).astype(jnp.bfloat16),
        w3=pad2(w3, wid_p, out_p).astype(jnp.bfloat16),
        b1=pad2(b1, 1, wid_p).astype(jnp.float32),
        b2=pad2(b2, 1, wid_p).astype(jnp.float32),
        b3=pad2(b3, 1, out_p).astype(jnp.float32),
    )
    return padded, (in_size, width, out_size)


@functools.partial(jax.jit, static_argnames=("lparam", "out_size", "block_rows"))
def dm_forward(x, padded_params, *, lparam, out_size, block_rows=512):
    """x: [B, input_size] float32. padded_params: output of prepare_params()."""
    w1p, b1p = padded_params["w1"], padded_params["b1"]
    w2p, b2p = padded_params["w2"], padded_params["b2"]
    w3p, b3p = padded_params["w3"], padded_params["b3"]

    B, in_size = x.shape
    in_p, wid_p = w1p.shape
    out_p = w3p.shape[1]

    # Row tile: pad batch to the tile size (at most one extra tile of waste).
    tb = min(block_rows, _round_up(B, SUBLANE))
    b_pad = _round_up(B, tb)

    xp = jnp.pad(x, ((0, b_pad - B), (0, in_p - in_size))).astype(jnp.bfloat16)

    grid = (b_pad // tb,)

    # Weights/biases: same block every grid step -> stay resident in VMEM.
    def resident(a):
        return pl.BlockSpec(a.shape, lambda i: (0,) * a.ndim)

    width = w1p.shape[1]  # padded, but only used for an advisory estimate
    flops = 2 * B * (in_size * width + width * width + width * out_size)
    bytes_accessed = (xp.size * 2
                      + (w1p.size + w2p.size + w3p.size) * 2
                      + (b1p.size + b2p.size + b3p.size) * 4
                      + b_pad * out_p * 4)

    y_padded = pl.pallas_call(
        functools.partial(_mlp_kernel, lparam=lparam),
        out_shape=jax.ShapeDtypeStruct((b_pad, out_p), jnp.float32),
        grid=grid,
        in_specs=[pl.BlockSpec((tb, in_p), lambda i: (i, 0)),
                  resident(w1p), resident(b1p),
                  resident(w2p), resident(b2p),
                  resident(w3p), resident(b3p)],
        out_specs=pl.BlockSpec((tb, out_p), lambda i: (i, 0)),
        compiler_params=pltpu.CompilerParams(
            dimension_semantics=("parallel",)),
        cost_estimate=pl.CostEstimate(flops=flops, transcendentals=0,
                                      bytes_accessed=bytes_accessed),
    )(xp, w1p, b1p, w2p, b2p, w3p, b3p)

    return y_padded[:B, :out_size]


def init_params(key, input_size, output_size, width):
    """Deterministic synthetic parameters (PyTorch-Linear-like uniform init)."""
    keys = jax.random.split(key, 6)

    def linear(kw, kb, fan_in, fan_out):
        bound = 1.0 / jnp.sqrt(fan_in)
        # stored as [in, out] (i.e. W.T relative to torch's [out, in])
        w = jax.random.uniform(kw, (fan_in, fan_out), jnp.float32, -bound, bound)
        b = jax.random.uniform(kb, (1, fan_out), jnp.float32, -bound, bound)
        return w, b

    w1, b1 = linear(keys[0], keys[1], input_size, width)
    w2, b2 = linear(keys[2], keys[3], width, width)
    w3, b3 = linear(keys[4], keys[5], width, output_size)
    return dict(w1=w1, b1=b1, w2=w2, b2=b2, w3=w3, b3=b3)


def reference_forward(x, p, lparam):
    leaky = lambda h: jnp.where(h >= 0, h, lparam * h)
    h = leaky(x @ p["w1"] + p["b1"])
    h = leaky(h @ p["w2"] + p["b2"])
    return h @ p["w3"] + p["b3"]


if __name__ == "__main__":
    input_size, output_size, width, lparam = 32, 16, 64, 0.01
    batch = 8

    key = jax.random.PRNGKey(0)
    kx, kp = jax.random.split(key)
    x = jax.random.normal(kx, (batch, input_size), jnp.float32)
    params = init_params(kp, input_size, output_size, width)

    padded_params, (_, _, out_size) = prepare_params(params)
    y = dm_forward(x, padded_params, lparam=lparam, out_size=out_size)
    jax.block_until_ready(y)

    y_ref = reference_forward(x, params, lparam)
    assert y.shape == (batch, output_size)
    # bf16 matmul inputs with f32 accumulation -> loosen tolerance vs f32 reference.
    assert jnp.allclose(y, y_ref, atol=5e-2, rtol=5e-2), "mismatch vs reference"

    print("KERNEL_OK")
</pallas_src>

<mosaic_0001>
module attributes {stable_mosaic.version = 11 : i64} {
  func.func @_mlp_kernel(%arg0: i32, %arg1: memref<8x128xbf16, #tpu.memory_space<vmem>>, %arg2: memref<128x128xbf16, #tpu.memory_space<vmem>>, %arg3: memref<1x128xf32, #tpu.memory_space<vmem>>, %arg4: memref<128x128xbf16, #tpu.memory_space<vmem>>, %arg5: memref<1x128xf32, #tpu.memory_space<vmem>>, %arg6: memref<128x128xbf16, #tpu.memory_space<vmem>>, %arg7: memref<1x128xf32, #tpu.memory_space<vmem>>, %arg8: memref<8x128xf32, #tpu.memory_space<vmem>>) attributes {dimension_semantics = [#tpu.dimension_semantics<parallel>], iteration_bounds = array<i64: 1>, scalar_prefetch = 0 : i64, scratch_operands = 0 : i64, tpu.core_type = #tpu.core_type<tc>, window_params = [{transform_indices = @transform_0, window_bounds = array<i64: 8, 128>}, {pipeline_mode = #tpu.pipeline_mode<synchronous>, transform_indices = @transform_1, window_bounds = array<i64: 128, 128>}, {pipeline_mode = #tpu.pipeline_mode<synchronous>, transform_indices = @transform_2, window_bounds = array<i64: 1, 128>}, {pipeline_mode = #tpu.pipeline_mode<synchronous>, transform_indices = @transform_3, window_bounds = array<i64: 128, 128>}, {pipeline_mode = #tpu.pipeline_mode<synchronous>, transform_indices = @transform_4, window_bounds = array<i64: 1, 128>}, {pipeline_mode = #tpu.pipeline_mode<synchronous>, transform_indices = @transform_5, window_bounds = array<i64: 128, 128>}, {pipeline_mode = #tpu.pipeline_mode<synchronous>, transform_indices = @transform_6, window_bounds = array<i64: 1, 128>}, {transform_indices = @transform_7, window_bounds = array<i64: 8, 128>}]} {
    %c0 = arith.constant 0 : index
    %c0_0 = arith.constant 0 : index
    %0 = vector.load %arg1[%c0, %c0_0] : memref<8x128xbf16, #tpu.memory_space<vmem>>, vector<8x128xbf16>
    %c0_1 = arith.constant 0 : index
    %c0_2 = arith.constant 0 : index
    %1 = vector.load %arg2[%c0_1, %c0_2] : memref<128x128xbf16, #tpu.memory_space<vmem>>, vector<128x128xbf16>
    %cst = arith.constant dense<0.000000e+00> : vector<8x128xf32>
    %2 = tpu.matmul %0, %1, %cst {dimension_numbers = #tpu.dot_dimension_numbers<[1], [0], [0], [1], [0, 0, 1, 1], [], []>} : vector<8x128xbf16>, vector<128x128xbf16>, vector<8x128xf32> -> vector<8x128xf32>
    %c0_3 = arith.constant 0 : index
    %c0_4 = arith.constant 0 : index
    %3 = vector.load %arg3[%c0_3, %c0_4] : memref<1x128xf32, #tpu.memory_space<vmem>>, vector<1x128xf32>
    %4 = vector.broadcast %3 : vector<1x128xf32> to vector<8x128xf32>
    %5 = arith.addf %2, %4 : vector<8x128xf32>
    %cst_5 = arith.constant 0.000000e+00 : f32
    %6 = vector.broadcast %cst_5 : f32 to vector<8x128xf32>
    %7 = arith.cmpf oge, %5, %6 : vector<8x128xf32>
    %cst_6 = arith.constant 0.00999999977 : f32
    %8 = vector.broadcast %cst_6 : f32 to vector<8x128xf32>
    %9 = arith.mulf %8, %5 : vector<8x128xf32>
    %10 = arith.select %7, %5, %9 : vector<8x128xi1>, vector<8x128xf32>
    %11 = arith.truncf %10 : vector<8x128xf32> to vector<8x128xbf16>
    %c0_7 = arith.constant 0 : index
    %c0_8 = arith.constant 0 : index
    %12 = vector.load %arg4[%c0_7, %c0_8] : memref<128x128xbf16, #tpu.memory_space<vmem>>, vector<128x128xbf16>
    %cst_9 = arith.constant dense<0.000000e+00> : vector<8x128xf32>
    %13 = tpu.matmul %11, %12, %cst_9 {dimension_numbers = #tpu.dot_dimension_numbers<[1], [0], [0], [1], [0, 0, 1, 1], [], []>} : vector<8x128xbf16>, vector<128x128xbf16>, vector<8x128xf32> -> vector<8x128xf32>
    %c0_10 = arith.constant 0 : index
    %c0_11 = arith.constant 0 : index
    %14 = vector.load %arg5[%c0_10, %c0_11] : memref<1x128xf32, #tpu.memory_space<vmem>>, vector<1x128xf32>
    %15 = vector.broadcast %14 : vector<1x128xf32> to vector<8x128xf32>
    %16 = arith.addf %13, %15 : vector<8x128xf32>
    %cst_12 = arith.constant 0.000000e+00 : f32
    %17 = vector.broadcast %cst_12 : f32 to vector<8x128xf32>
    %18 = arith.cmpf oge, %16, %17 : vector<8x128xf32>
    %cst_13 = arith.constant 0.00999999977 : f32
    %19 = vector.broadcast %cst_13 : f32 to vector<8x128xf32>
    %20 = arith.mulf %19, %16 : vector<8x128xf32>
    %21 = arith.select %18, %16, %20 : vector<8x128xi1>, vector<8x128xf32>
    %22 = arith.truncf %21 : vector<8x128xf32> to vector<8x128xbf16>
    %c0_14 = arith.constant 0 : index
    %c0_15 = arith.constant 0 : index
    %23 = vector.load %arg6[%c0_14, %c0_15] : memref<128x128xbf16, #tpu.memory_space<vmem>>, vector<128x128xbf16>
    %cst_16 = arith.constant dense<0.000000e+00> : vector<8x128xf32>
    %24 = tpu.matmul %22, %23, %cst_16 {dimension_numbers = #tpu.dot_dimension_numbers<[1], [0], [0], [1], [0, 0, 1, 1], [], []>} : vector<8x128xbf16>, vector<128x128xbf16>, vector<8x128xf32> -> vector<8x128xf32>
    %c0_17 = arith.constant 0 : index
    %c0_18 = arith.constant 0 : index
    %25 = vector.load %arg7[%c0_17, %c0_18] : memref<1x128xf32, #tpu.memory_space<vmem>>, vector<1x128xf32>
    %26 = vector.broadcast %25 : vector<1x128xf32> to vector<8x128xf32>
    %27 = arith.addf %24, %26 : vector<8x128xf32>
    %c0_19 = arith.constant 0 : index
    %c0_20 = arith.constant 0 : index
    %28 = vector.load %arg8[%c0_19, %c0_20] : memref<8x128xf32, #tpu.memory_space<vmem>>, vector<8x128xf32>
    tpu.vector_store %arg8[%c0_19, %c0_20], %27 {strides = array<i32>} : memref<8x128xf32, #tpu.memory_space<vmem>>, vector<8x128xf32>,
    return
  }
  func.func @transform_0(%arg0: i32) -> (i32, i32) {
    %c0_i32 = arith.constant 0 : i32
    %c0_i32_0 = arith.constant 0 : i32
    return %arg0, %c0_i32 : i32, i32
  }
  func.func @transform_1(%arg0: i32) -> (i32, i32) {
    %c0_i32 = arith.constant 0 : i32
    %c0_i32_0 = arith.constant 0 : i32
    %c0_i32_1 = arith.constant 0 : i32
    return %c0_i32, %c0_i32_0 : i32, i32
  }
  func.func @transform_2(%arg0: i32) -> (i32, i32) {
    %c0_i32 = arith.constant 0 : i32
    %c0_i32_0 = arith.constant 0 : i32
    %c0_i32_1 = arith.constant 0 : i32
    return %c0_i32, %c0_i32_0 : i32, i32
  }
  func.func @transform_3(%arg0: i32) -> (i32, i32) {
    %c0_i32 = arith.constant 0 : i32
    %c0_i32_0 = arith.constant 0 : i32
    %c0_i32_1 = arith.constant 0 : i32
    return %c0_i32, %c0_i32_0 : i32, i32
  }
  func.func @transform_4(%arg0: i32) -> (i32, i32) {
    %c0_i32 = arith.constant 0 : i32
    %c0_i32_0 = arith.constant 0 : i32
    %c0_i32_1 = arith.constant 0 : i32
    return %c0_i32, %c0_i32_0 : i32, i32
  }
  func.func @transform_5(%arg0: i32) -> (i32, i32) {
    %c0_i32 = arith.constant 0 : i32
    %c0_i32_0 = arith.constant 0 : i32
    %c0_i32_1 = arith.constant 0 : i32
    return %c0_i32, %c0_i32_0 : i32, i32
  }
  func.func @transform_6(%arg0: i32) -> (i32, i32) {
    %c0_i32 = arith.constant 0 : i32
    %c0_i32_0 = arith.constant 0 : i32
    %c0_i32_1 = arith.constant 0 : i32
    return %c0_i32, %c0_i32_0 : i32, i32
  }
  func.func @transform_7(%arg0: i32) -> (i32, i32) {
    %c0_i32 = arith.constant 0 : i32
    %c0_i32_0 = arith.constant 0 : i32
    return %arg0, %c0_i32 : i32, i32
  }
}

</mosaic_0001>

<bundles_post_ra>
// kernel: dm_forward.1
= control target key start
LH: loop header
LB: loop body
LE: loop exit
PB: predicated region body
PF: predicated region fallthrough
CT: control target
= control target key end

     0   :  { %12 = vsyncpa [#allocation3], 0  ;;  %s762_s0 = inlined_call_operand.vmem [shape: bf16[8,128], index: 0, kind: input, shape index: {}]   ;;  %s763_s1 = inlined_call_operand.hbm [shape: bf16[128,128], index: 1, kind: input, shape index: {}]   ;;  %s764_s2 = inlined_call_operand.vmem [shape: f32[1,128], index: 2, kind: input, shape index: {}]   ;;  %s765_s3 = inlined_call_operand.hbm [shape: bf16[128,128], index: 3, kind: input, shape index: {}]   ;;  %s766_s4 = inlined_call_operand.vmem [shape: f32[1,128], index: 4, kind: input, shape index: {}]   ;;  %s767_s5 = inlined_call_operand.hbm [shape: bf16[128,128], index: 5, kind: input, shape index: {}]   ;;  %s768_s6 = inlined_call_operand.vmem [shape: f32[1,128], index: 6, kind: input, shape index: {}]   ;;  %s769_s7 = inlined_call_operand.hbm [shape: f32[8,128], index: 7, kind: output, shape index: {}]  }
   0x1   :  { %13 = vsyncpa [#allocation6], 0 }
   0x2   :  { %14 = vsyncpa [#allocation4], 0  ;;  %s660_s24 = smov [#allocation5]   ;;  %s661_s26 = smov [#allocation2]  }
   0x3   :  { %s36_s25 = sshll.u32 %s660_s24, 4  ;;  %s22_s27 = sshll.u32 %s661_s26, 4  ;;  %s37_s25 = int_to_ptr.vmem [resolvable:$true] %s36_s25  ;;  %s23_s27 = int_to_ptr.vmem [resolvable:$true] %s22_s27 }
   0x4   :  { %s582_s28 = scalar_lea.vmem %s37_s25, 1024  ;;  %p587_p1 = scmp.lt.s32.totalorder %s37_s25, %s37_s25 }
   0x5   :  { %p583_p0 = scmp.ne.s32.totalorder %s37_s25, %s582_s28  ;;  %p588_p2 = scmp.lt.s32.totalorder %s582_s28, %s582_s28 }
   0x7   :  { %p589_p3 = por %p588_p2, %p587_p1 }
   0x9   :  { %p590_p4 = pnand %p589_p3, %p583_p0 }
   0xb   :  { %593 = shalt.err (!%p590_p4)
}
   0xc   :  { %s662_s29 = smov 64   ;;  %s663_s30 = smov 4  }
   0xd   :  { %42 = dma.hbm_to_vmem [thread:$0]  %s765_s3, 1024, %s37_s25, [#allocation6], %s662_s29, %s662_s29, %s663_s30  }
   0xe   :  { %s602_s10 = scalar_lea.vmem %s23_s27, 1024  ;;  %p607_p6 = scmp.lt.s32.totalorder %s23_s27, %s23_s27 }
   0xf   :  { %p603_p5 = scmp.ne.s32.totalorder %s23_s27, %s602_s10  ;;  %p608_p7 = scmp.lt.s32.totalorder %s602_s10, %s602_s10 }
  0x11   :  { %p609_p8 = por %p608_p7, %p607_p6 }
  0x13   :  { %p610_p9 = pnand %p609_p8, %p603_p5 }
  0x15   :  { %613 = shalt.err (!%p610_p9)
}
  0x16   :  { %28 = dma.hbm_to_vmem [thread:$0]  %s763_s1, 1024, %s23_s27, [#allocation3], %s662_s29, %s662_s29, %s663_s30  }
  0x17   :  { %s664_s13 = smov [#allocation7]  }
  0x18   :  { %s50_s14 = sshll.u32 %s664_s13, 4  ;;  %s51_s14 = int_to_ptr.vmem [resolvable:$true] %s50_s14 }
  0x19   :  { %s622_s15 = scalar_lea.vmem %s51_s14, 1024  ;;  %p627_p11 = scmp.lt.s32.totalorder %s51_s14, %s51_s14 }
  0x1a   :  { %p623_p10 = scmp.ne.s32.totalorder %s51_s14, %s622_s15  ;;  %p628_p12 = scmp.lt.s32.totalorder %s622_s15, %s622_s15 }
  0x1c   :  { %p629_p13 = por %p628_p12, %p627_p11 }
  0x1e   :  { %p630_p0 = pnand %p629_p13, %p623_p10 }
  0x20   :  { %633 = shalt.err (!%p630_p0)
}
  0x21   :  { %56 = dma.hbm_to_vmem [thread:$0]  %s767_s5, 1024, %s51_s14, [#allocation6], %s662_s29, %s662_s29, %s663_s30  }
  0x22   :  { %654 = dma.done.wait [#allocation3], 1024  }
  0x23   :  { %655 = vsyncadd [#allocation3], 4294966272 }
  0x24   :  { %656 = dma.done.wait [#allocation6], 2048  }
  0x25   :  { %657 = vsyncadd [#allocation6], 4294965248  ;;  %v665_v0 = vmov 0.0   ;;  %vm666_vm0 = vmmov 0   ;;  %v550_v1 = vld [vmem:[#allocation2 + $0x38] sm:$0xff]   ;;  %v551_v2 = vld [vmem:[#allocation2 + $0x30] sm:$0xff]  }
  0x26   :  { %482 = vmatprep.subr.bf16.mxu0 %v665_v0  ;;  %498 = vmatprep.mubr.msk.bf16.mxu0 %vm666_vm0, %v665_v0  ;;  %v552_v3 = vld [vmem:[#allocation2 + $0x28] sm:$0xff]   ;;  %v558_v4 = vld [vmem:[#allocation5 + $0x38] sm:$0xff]   ;;  %v553_v5 = vld [vmem:[#allocation2 + $0x20] sm:$0xff]   ;;  %s667_s21 = smov [#allocation8]  }
  0x27   :  { %502 = vmatprep.subr.bf16.mxu1 %v665_v0  ;;  %518 = vmatprep.mubr.msk.bf16.mxu1 %vm666_vm0, %v665_v0  ;;  %v559_v6 = vld [vmem:[#allocation5 + $0x30] sm:$0xff]   ;;  %v554_v7 = vld [vmem:[#allocation2 + $0x18] sm:$0xff]   ;;  %v560_v8 = vld [vmem:[#allocation5 + $0x28] sm:$0xff]   ;;  %s418_s22 = sshll.u32 %s667_s21, 4  ;;  %s419_s22 = int_to_ptr.vmem [resolvable:$true] %s418_s22 }
  0x28   :  { %483 = vmatpush3.bf16.msra.mxu0 %v550_v1  ;;  %503 = vmatpush3.bf16.msra.mxu1 %v558_v4  ;;  %v555_v9 = vld [vmem:[#allocation2 + $0x10] sm:$0xff]   ;;  %v561_v10 = vld [vmem:[#allocation5 + $0x20] sm:$0xff]   ;;  %v556_v11 = vld [vmem:[#allocation2 + $0x8] sm:$0xff]   ;;  %p639_p2 = scmp.lt.s32.totalorder %s419_s22, %s419_s22 }
  0x29   :  { %484 = vmatprep.subr.bf16.mxu0 %v665_v0  ;;  %504 = vmatprep.subr.bf16.mxu1 %v665_v0  ;;  %v562_v12 = vld [vmem:[#allocation5 + $0x18] sm:$0xff]   ;;  %v557_v13 = vld [vmem:[#allocation2] sm:$0xff]   ;;  %v563_v14 = vld [vmem:[#allocation5 + $0x10] sm:$0xff]  }
  0x2a   :  { %v69_v15 = vld [vmem:[%s762_s0] sm:$0xf]  ;;  %v564_v16 = vld [vmem:[#allocation5 + $0x8] sm:$0xff]   ;;  %v566_v18 = vld [vmem:[#allocation7 + $0x38] sm:$0xff]  }
  0x2b   :  { %v565_v17 = vld [vmem:[#allocation5] sm:$0xff]   ;;  %v567_v19 = vld [vmem:[#allocation7 + $0x30] sm:$0xff]   ;;  %v568_v20 = vld [vmem:[#allocation7 + $0x28] sm:$0xff]  }
  0x2c   :  { %485 = vmatpush3.bf16.msra.mxu0 %v551_v2  ;;  %505 = vmatpush3.bf16.msra.mxu1 %v559_v6  ;;  %v569_v21 = vld [vmem:[#allocation7 + $0x20] sm:$0xff]   ;;  %v570_v22 = vld [vmem:[#allocation7 + $0x18] sm:$0xff]   ;;  %v571_v23 = vld [vmem:[#allocation7 + $0x10] sm:$0xff]  }
  0x2d   :  { %486 = vmatprep.subr.bf16.mxu0 %v665_v0  ;;  %506 = vmatprep.subr.bf16.mxu1 %v665_v0  ;;  %v428_v24 = vld [vmem:[%s764_s2] ss:$0 sm:$0xff]  ;;  %v572_v33 = vld [vmem:[#allocation7 + $0x8] sm:$0xff]  }
  0x2e   :  { %v573_v34 = vld [vmem:[#allocation7] sm:$0xff]  }
  0x2f   :  { %v437_v35 = vld [vmem:[%s766_s4] ss:$0 sm:$0xff]  ;;  %s634_s4 = scalar_lea.vmem %s419_s22, 128 }
  0x30   :  { %487 = vmatpush3.bf16.msra.mxu0 %v552_v3  ;;  %507 = vmatpush3.bf16.msra.mxu1 %v560_v8  ;;  %v446_v44 = vld [vmem:[%s768_s6] ss:$0 sm:$0xff]  ;;  %p635_p1 = scmp.ne.s32.totalorder %s419_s22, %s634_s4  ;;  %p640_p3 = scmp.lt.s32.totalorder %s634_s4, %s634_s4 }
  0x31   :  { %488 = vmatprep.subr.bf16.mxu0 %v665_v0  ;;  %508 = vmatprep.subr.bf16.mxu1 %v665_v0 }
  0x32   :  { %p641_p4 = por %p640_p3, %p639_p2 }
  0x34   :  { %489 = vmatpush3.bf16.msra.mxu0 %v553_v5  ;;  %509 = vmatpush3.bf16.msra.mxu1 %v561_v10  ;;  %p642_p5 = pnand %p641_p4, %p635_p1 }
  0x35   :  { %490 = vmatprep.subr.bf16.mxu0 %v665_v0  ;;  %510 = vmatprep.subr.bf16.mxu1 %v665_v0 }
  0x38   :  { %491 = vmatpush3.bf16.msra.mxu0 %v554_v7  ;;  %511 = vmatpush3.bf16.msra.mxu1 %v562_v12 }
  0x39   :  { %492 = vmatprep.subr.bf16.mxu0 %v665_v0  ;;  %512 = vmatprep.subr.bf16.mxu1 %v665_v0 }
  0x3c   :  { %493 = vmatpush3.bf16.msra.mxu0 %v555_v9  ;;  %513 = vmatpush3.bf16.msra.mxu1 %v563_v14 }
  0x3d   :  { %494 = vmatprep.subr.bf16.mxu0 %v665_v0  ;;  %514 = vmatprep.subr.bf16.mxu1 %v665_v0 }
  0x40   :  { %495 = vmatpush3.bf16.msra.mxu0 %v556_v11  ;;  %515 = vmatpush3.bf16.msra.mxu1 %v564_v16 }
  0x41   :  { %496 = vmatprep.subr.bf16.mxu0 %v665_v0  ;;  %516 = vmatprep.subr.bf16.mxu1 %v665_v0 }
  0x44   :  { %497 = vmatpush3.bf16.msra.mxu0 %v557_v13  ;;  %517 = vmatpush3.bf16.msra.mxu1 %v565_v17 }
  0x45   :  { %522 = vmatprep.subr.bf16.mxu0 %v665_v0 }
  0x47   :  { %499 = vmatmul.mubr.bf16.vlgmr.msra.gmra.mxu0 %v69_v15 }
  0x48   :  { %538 = vmatprep.mubr.msk.bf16.mxu0 %vm666_vm0, %v665_v0  ;;  %523 = vmatpush3.bf16.msra.mxu0 %v566_v18 }
  0x49   :  { %524 = vmatprep.subr.bf16.mxu0 %v665_v0 }
  0x4c   :  { %525 = vmatpush3.bf16.msra.mxu0 %v567_v19 }
  0x4d   :  { %526 = vmatprep.subr.bf16.mxu0 %v665_v0 }
  0x50   :  { %527 = vmatpush3.bf16.msra.mxu0 %v568_v20 }
  0x51   :  { %528 = vmatprep.subr.bf16.mxu0 %v665_v0 }
  0x54   :  { %529 = vmatpush3.bf16.msra.mxu0 %v569_v21 }
  0x55   :  { %530 = vmatprep.subr.bf16.mxu0 %v665_v0 }
  0x58   :  { %531 = vmatpush3.bf16.msra.mxu0 %v570_v22 }
  0x59   :  { %532 = vmatprep.subr.bf16.mxu0 %v665_v0 }
  0x5c   :  { %533 = vmatpush3.bf16.msra.mxu0 %v571_v23 }
  0x5d   :  { %534 = vmatprep.subr.bf16.mxu0 %v665_v0 }
  0x60   :  { %535 = vmatpush3.bf16.msra.mxu0 %v572_v33 }
  0x61   :  { %536 = vmatprep.subr.bf16.mxu0 %v665_v0 }
  0x64   :  { %537 = vmatpush3.bf16.msra.mxu0 %v573_v34 }
 0x107   :  { %v175_v25 = vpop.f32.mrf.mxu0 }
 0x108   :  { %v176_v26 = vadd.f32 %v428_v24, %v175_v25 }
 0x109   :  { %v500_v27 = vpop.f32.mrf.mxu0 }
 0x10a   :  { %vm181_vm1 = vcmp.ge.f32.partialorder %v176_v26, 0.0  ;;  %v182_v28 = vmul.f32 0.01, %v176_v26 }
 0x10b   :  { %v178_v29 = vpop.f32.mrf.mxu0 }
 0x10c   :  { %v183_v30 = vsel %vm181_vm1, %v176_v26, %v182_v28 }
 0x10d   :  { %v501_v31 = vpop.f32.mrf.mxu0  ;;  %v184_v32 = vpack.c.bf16 %v183_v30, %v183_v30 }
 0x10f   :  { %519 = vmatmul.mubr.bf16.vlgmr.msra.gmra.mxu1 %v184_v32 }
 0x1cf   :  { %v290_v36 = vpop.f32.mrf.mxu1 }
 0x1d0   :  { %v291_v37 = vadd.f32 %v437_v35, %v290_v36 }
 0x1d1   :  { %v520_v38 = vpop.f32.mrf.mxu1 }
 0x1d2   :  { %vm296_vm2 = vcmp.ge.f32.partialorder %v291_v37, 0.0  ;;  %v297_v39 = vmul.f32 0.01, %v291_v37 }
 0x1d3   :  { %v293_v40 = vpop.f32.mrf.mxu1 }
 0x1d4   :  { %v298_v41 = vsel %vm296_vm2, %v291_v37, %v297_v39 }
 0x1d5   :  { %v299_v42 = vpack.c.bf16 %v298_v41, %v298_v41  ;;  %v521_v43 = vpop.f32.mrf.mxu1 }
 0x1d7   :  { %539 = vmatmul.mubr.bf16.vlgmr.msra.gmra.mxu0 %v299_v42 }
 0x297   :  { %v405_v45 = vpop.f32.mrf.mxu0 }
 0x298   :  { %v406_v46 = vadd.f32 %v446_v44, %v405_v45 }
 0x299   :  { %v540_v47 = vpop.f32.mrf.mxu0 }
 0x29a   :  { %411 = vst [vmem:[#allocation8] sm:$0xff] %v406_v46 }
 0x29b   :  { %v408_v48 = vpop.f32.mrf.mxu0 }
 0x29c   :  { %645 = shalt.err (!%p642_p5)
}
 0x29d   :  { %421 = dma.vmem_to_hbm [thread:$0]  %s419_s22, 128, %s769_s7, [#allocation4]   ;;  %v541_v49 = vpop.f32.mrf.mxu0 }
 0x29e   :  { %658 = dma.done.wait [#allocation4], 128  }
 0x29f   :  { %659 = vsyncadd [#allocation4], 4294967168 }
 0x2a0   :  { %425 = vsyncpa [#allocation3], 1 }
 0x2a1   :  { %426 = vsyncpa [#allocation6], 1 }
 0x2a2   :  { %427 = vsyncpa [#allocation4], 1 }

</bundles_post_ra>
